<compile_context>
chip_gen: v7x
topology: tpu7x:2x2x1
jax: 0.10.0
libtpu: 0.0.40
codegen_flags: <defaults>
</compile_context>

<pallas_src>
import math

import jax
import jax.numpy as jnp
from jax.experimental import pallas as pl
from jax.experimental.pallas import tpu as pltpu


def _add_pos_embed_kernel(x_ref, pe_ref, o_ref):
    # x_ref / o_ref: (R, C) tile of the flattened (B, N) activations.
    # pe_ref:        (1, C) tile of the flattened positional embedding,
    #                resident across the row grid axis, broadcast over rows.
    o_ref[...] = x_ref[...] + pe_ref[...]


def _choose_block(b, n, elem_bytes, budget_bytes):
    """Pick a (rows, cols) block for the flattened (b, n) elementwise add.

    Blocks obey the TPU (8, 128) tiling rule: rows is a multiple of 8 or the
    full b; cols is a multiple of 128 or the full n.  Target ~budget_bytes per
    block so per-grid-step overhead is amortized and the DMA stays near HBM
    roofline without blowing the scoped VMEM limit (double-buffered x/out +
    resident pe ~= 5x the block bytes).
    """
    if b * n * elem_bytes <= budget_bytes:
        return b, n  # whole array in one block — trivial grid
    # Prefer row tiling: keeps the pe block full-width and fully resident.
    rows_fit = budget_bytes // (n * elem_bytes)
    if rows_fit >= 8:
        rows = min(b, (rows_fit // 8) * 8)
        return rows, n
    # Even an 8-row full-width block is over budget: tile the lane dim too.
    rows = min(b, 8)
    cols = max(128, (budget_bytes // (rows * elem_bytes)) // 128 * 128)
    if cols >= n:
        cols = n
    return rows, cols


def add_position_embs(inputs: jnp.ndarray,
                      pos_embed: jnp.ndarray,
                      history_dim=None,
                      *,
                      target_block_bytes: int = 2 * 1024 * 1024,
                      vmem_limit_bytes=None) -> jnp.ndarray:
    """Adds learned positional embeddings to `inputs`.

    inputs:    (B, T, D) (or (B, *per_example_shape))
    pos_embed: per-example-shaped embedding; with history_dim it may be longer
               along that axis and is statically sliced to the input length.
    """
    bs = inputs.shape[0]
    pe = pos_embed
    if history_dim is not None:
        history_len = inputs.shape[1:][history_dim]
        idx = (slice(None),) * history_dim + (slice(0, history_len),)
        pe = pe[idx]
    # Shape check on every path (catches mismatches the torch module misses).
    assert tuple(pe.shape) == tuple(inputs.shape[1:]), (
        f"pos_embed shape {tuple(pe.shape)} != per-example input shape "
        f"{tuple(inputs.shape[1:])}")

    # Cast once in the wrapper, not every grid step on the VPU.
    # Numerics: cast pe to the activation dtype, then add (matches torch when
    # dtypes agree; chosen convention when they differ).
    pe = pe.astype(inputs.dtype)

    # Lane-dense flattened views: (B, N) and (1, N) with N = prod(T, D, ...).
    n = math.prod(pe.shape)
    x2 = inputs.reshape(bs, n)
    pe2 = pe.reshape(1, n)

    elem_bytes = jnp.dtype(inputs.dtype).itemsize
    rows, cols = _choose_block(bs, n, elem_bytes, target_block_bytes)
    grid = (pl.cdiv(bs, rows), pl.cdiv(n, cols))

    out2 = pl.pallas_call(
        _add_pos_embed_kernel,
        out_shape=jax.ShapeDtypeStruct((bs, n), inputs.dtype),
        grid_spec=pltpu.PrefetchScalarGridSpec(
            num_scalar_prefetch=0,
            grid=grid,
            in_specs=[
                # Activations: tiled over (rows, cols).
                pl.BlockSpec((rows, cols), lambda i, j: (i, j)),
                # Positional embedding: same row block every row step
                # (resident), tiled only along the lane dimension.
                pl.BlockSpec((1, cols), lambda i, j: (0, j)),
            ],
            out_specs=pl.BlockSpec((rows, cols), lambda i, j: (i, j)),
        ),
        compiler_params=pltpu.CompilerParams(
            dimension_semantics=("parallel", "parallel"),
            vmem_limit_bytes=vmem_limit_bytes,
        ),
    )(x2, pe2)

    return out2.reshape(inputs.shape)


if __name__ == "__main__":
    key = jax.random.PRNGKey(0)
    k_x, k_pe, k_x2, k_pe2 = jax.random.split(key, 4)

    # --- Small shapes implied by the forward: (bs, timesteps, in_dim) ------
    B, T, D = 2, 8, 32
    inputs = jax.random.normal(k_x, (B, T, D), dtype=jnp.float32)
    # Deterministic parameter init, mirroring torch.randn(*emb_shape) * 0.02
    pos_embed = jax.random.normal(k_pe, (T, D), dtype=jnp.float32) * 0.02

    out = add_position_embs(inputs, pos_embed)
    out = jax.block_until_ready(out)
    ref = inputs + pos_embed[None, :, :]
    assert out.shape == (B, T, D)
    assert jnp.allclose(out, ref, atol=1e-6), "Pallas output mismatch (base)"

    # --- history_dim path: pos_embed longer along the history axis ---------
    pos_embed_hist = jax.random.normal(k_pe2, (16, D), dtype=jnp.float32) * 0.02
    out_h = add_position_embs(inputs, pos_embed_hist, history_dim=0)
    out_h = jax.block_until_ready(out_h)
    ref_h = inputs + pos_embed_hist[:T][None, :, :]
    assert jnp.allclose(out_h, ref_h, atol=1e-6), "Pallas output mismatch (history_dim)"

    # --- Larger shape to exercise the row-tiled grid path ------------------
    B2, T2, D2 = 128, 64, 128
    x_big = jax.random.normal(k_x2, (B2, T2, D2), dtype=jnp.float32)
    pe_big = jax.random.normal(k_pe2, (T2, D2), dtype=jnp.float32) * 0.02
    out_big = add_position_embs(x_big, pe_big)
    out_big = jax.block_until_ready(out_big)
    ref_big = x_big + pe_big[None, :, :]
    assert jnp.allclose(out_big, ref_big, atol=1e-6), "Pallas output mismatch (tiled)"

    print("KERNEL_OK")
</pallas_src>

<mosaic_0001>
module attributes {stable_mosaic.version = 11 : i64} {
  func.func @_add_pos_embed_kernel(%arg0: i32, %arg1: i32, %arg2: memref<2x256xf32, #tpu.memory_space<vmem>>, %arg3: memref<1x256xf32, #tpu.memory_space<vmem>>, %arg4: memref<2x256xf32, #tpu.memory_space<vmem>>) attributes {dimension_semantics = [#tpu.dimension_semantics<parallel>, #tpu.dimension_semantics<parallel>], iteration_bounds = array<i64: 1, 1>, scalar_prefetch = 0 : i64, scratch_operands = 0 : i64, tpu.core_type = #tpu.core_type<tc>, window_params = [{transform_indices = @transform_0, window_bounds = array<i64: 2, 256>}, {transform_indices = @transform_1, window_bounds = array<i64: 1, 256>}, {transform_indices = @transform_2, window_bounds = array<i64: 2, 256>}]} {
    %c0 = arith.constant 0 : index
    %c0_0 = arith.constant 0 : index
    %0 = vector.load %arg2[%c0, %c0_0] : memref<2x256xf32, #tpu.memory_space<vmem>>, vector<2x256xf32>
    %c0_1 = arith.constant 0 : index
    %c0_2 = arith.constant 0 : index
    %1 = vector.load %arg3[%c0_1, %c0_2] : memref<1x256xf32, #tpu.memory_space<vmem>>, vector<1x256xf32>
    %2 = vector.broadcast %1 : vector<1x256xf32> to vector<2x256xf32>
    %3 = arith.addf %0, %2 : vector<2x256xf32>
    %c0_3 = arith.constant 0 : index
    %c0_4 = arith.constant 0 : index
    %4 = vector.load %arg4[%c0_3, %c0_4] : memref<2x256xf32, #tpu.memory_space<vmem>>, vector<2x256xf32>
    tpu.vector_store %arg4[%c0_3, %c0_4], %3 {strides = array<i32>} : memref<2x256xf32, #tpu.memory_space<vmem>>, vector<2x256xf32>,
    return
  }
  func.func @transform_0(%arg0: i32, %arg1: i32) -> (i32, i32) {
    %c0_i32 = arith.constant 0 : i32
    return %arg0, %arg1 : i32, i32
  }
  func.func @transform_1(%arg0: i32, %arg1: i32) -> (i32, i32) {
    %c0_i32 = arith.constant 0 : i32
    %c0_i32_0 = arith.constant 0 : i32
    return %c0_i32, %arg1 : i32, i32
  }
  func.func @transform_2(%arg0: i32, %arg1: i32) -> (i32, i32) {
    %c0_i32 = arith.constant 0 : i32
    return %arg0, %arg1 : i32, i32
  }
}

</mosaic_0001>

<bundles_post_ra>
// kernel: tpu_custom_call.1
= control target key start
LH: loop header
LB: loop body
LE: loop exit
PB: predicated region body
PF: predicated region fallthrough
CT: control target
= control target key end

     0   :  { %7 = vsyncpa [#allocation3], 0  ;;  %s157_s0 = inlined_call_operand.hbm [shape: f32[2,256], index: 0, kind: input, shape index: {}]   ;;  %s158_s1 = inlined_call_operand.vmem [shape: f32[1,256], index: 1, kind: input, shape index: {}]   ;;  %s159_s2 = inlined_call_operand.hbm [shape: f32[2,256], index: 2, kind: output, shape index: {}]  }
   0x1   :  { %8 = vsyncpa [#allocation4], 0  ;;  %s112_s9 = smov [#allocation2]   ;;  %s64_s13 = scalar_lea.hbm %s157_s0, 64 }
   0x2   :  { %s15_s10 = sshll.u32 %s112_s9, 4  ;;  %p65_p0 = scmp.ne.s32.totalorder %s157_s0, %s64_s13  ;;  %s16_s10 = int_to_ptr.vmem [resolvable:$true] %s15_s10 }
   0x3   :  { %p68_p1 = scmp.lt.u32.totalorder %s64_s13, %s157_s0 }
   0x5   :  { %p70_p2 = pnand %p68_p1, %p65_p0 }
   0x7   :  { %73 = shalt.err (!%p70_p2)
}
   0x8   :  { %s74_s18 = scalar_lea.vmem %s16_s10, 64  ;;  %p79_p4 = scmp.lt.s32.totalorder %s16_s10, %s16_s10 }
   0x9   :  { %p75_p3 = scmp.ne.s32.totalorder %s16_s10, %s74_s18  ;;  %p80_p5 = scmp.lt.s32.totalorder %s74_s18, %s74_s18 }
   0xb   :  { %p81_p6 = por %p80_p5, %p79_p4 }
   0xd   :  { %p82_p7 = pnand %p81_p6, %p75_p3 }
   0xf   :  { %85 = shalt.err (!%p82_p7)
}
  0x10   :  { %18 = dma.hbm_to_vmem [thread:$0]  %s157_s0, 64, %s16_s10, [#allocation3]  }
  0x11   :  { %108 = dma.done.wait [#allocation3], 64  }
  0x12   :  { %109 = vsyncadd [#allocation3], 4294967232  ;;  %v27_v0 = vlaneseq  ;;  %v113_v1 = vmov 1983009808   ;;  %v25_v7 = vld [vmem:[%s158_s1] sm:$0x3] }
  0x13   :  { %v37_v2 = vunpack.c.l.s4 %v113_v1  ;;  %v24_v12 = vld [vmem:[#allocation2] sm:$0xf]  ;;  %s114_s23 = smov [#allocation5]  }
  0x14   :  { %v28_v3 = vshrl.u32 %v27_v0, 7  ;;  %s52_s0 = sshll.u32 %s114_s23, 4  ;;  %s53_s0 = int_to_ptr.vmem [resolvable:$true] %s52_s0 }
  0x15   :  { %v38_v6 = vunpack.c.0.s8 %v37_v2  ;;  %s86_s24 = scalar_lea.vmem %s53_s0, 64  ;;  %p91_p9 = scmp.lt.s32.totalorder %s53_s0, %s53_s0 }
  0x16   :  { %v29_v4 = vsub.s32 0, %v28_v3  ;;  %v33_v5 = vsub.s32 1, %v28_v3  ;;  %p87_p8 = scmp.ne.s32.totalorder %s53_s0, %s86_s24  ;;  %p92_p10 = scmp.lt.s32.totalorder %s86_s24, %s86_s24 }
  0x17   :  { %v41_v10 = vsub.s32 %v38_v6, %v28_v3 }
  0x18   :  { %v30_v8 = vrot.slane %v25_v7, %v29_v4  ;;  %v34_v9 = vrot.slane %v25_v7, %v33_v5  ;;  %p93_p11 = por %p92_p10, %p91_p9 }
  0x1a   :  { %v35_v11 = vcombine.low %v30_v8, %v34_v9  ;;  %p94_p12 = pnand %p93_p11, %p87_p8 }
  0x1c   :  { %v42_v13 = vrot.slane %v35_v11, %v41_v10 }
  0x1e   :  { %v44_v14 = vadd.f32 %v42_v13, %v24_v12 }
  0x20   :  { %45 = vst [vmem:[#allocation5] sm:$0xf] %v44_v14 }
  0x21   :  { %97 = shalt.err (!%p94_p12)
}
  0x22   :  { %s98_s26 = scalar_lea.hbm %s159_s2, 64 }
  0x23   :  { %p99_p13 = scmp.ne.s32.totalorder %s159_s2, %s98_s26  ;;  %p102_p0 = scmp.lt.u32.totalorder %s98_s26, %s159_s2 }
  0x25   :  { %p104_p1 = pnand %p102_p0, %p99_p13 }
  0x27   :  { %107 = shalt.err (!%p104_p1)
}
  0x28   :  { %55 = dma.vmem_to_hbm [thread:$0]  %s53_s0, 64, %s159_s2, [#allocation4]  }
  0x29   :  { %110 = dma.done.wait [#allocation4], 64  }
  0x2a   :  { %111 = vsyncadd [#allocation4], 4294967232 }
  0x2b   :  { %59 = vsyncpa [#allocation3], 1 }
  0x2c   :  { %60 = vsyncpa [#allocation4], 1 }

</bundles_post_ra>
